<compile_context>
chip_gen: v7x
topology: tpu7x:2x2x1
jax: 0.10.0
libtpu: 0.0.40
codegen_flags: <defaults>
</compile_context>

<pallas_src>
import functools

import jax
import jax.numpy as jnp
from jax.experimental import pallas as pl
from jax.experimental.pallas import tpu as pltpu


def _elu(x):
    # ELU with alpha=1 (PyTorch default). expm1 on the clamped arg for numerical safety.
    return jnp.where(x > 0, x, jnp.expm1(jnp.minimum(x, 0.0)))


@functools.lru_cache(maxsize=None)
def _roll_is_forward() -> bool:
    """True if pltpu.roll(x, s) moves element i to index (i + s) (jnp.roll convention).

    Checked once with a tiny kernel so the main kernel is robust to the rotate-direction
    convention of the installed jax / Mosaic version.
    """
    def probe(x_ref, o_ref):
        o_ref[...] = pltpu.roll(x_ref[...], shift=1, axis=1)

    x = jnp.broadcast_to(jnp.arange(128, dtype=jnp.float32), (8, 128))
    y = pl.pallas_call(probe, out_shape=jax.ShapeDtypeStruct((8, 128), jnp.float32))(x)
    return bool(y[0, 0] == 127.0)


def _roll(x, shift, forward):
    """out[..., j] = x[..., (j - shift) % W]  (jnp.roll semantics, static shift)."""
    w = x.shape[-1]
    s = shift % w
    if s == 0:
        return x
    return pltpu.roll(x, shift=s if forward else w - s, axis=x.ndim - 1)


def _residual_unit_kernel(*refs, dilation: int, channels: int, tile: int, halo: int,
                          roll_forward: bool, has_halo: bool):
    C, TL, HW, d = channels, tile, halo, dilation
    if has_halo:
        xc_ref, hl_ref, hr_ref, w1_ref, wsq_ref, b_ref, o_ref = refs
    else:
        xc_ref, w1_ref, wsq_ref, b_ref, o_ref = refs

    xc = xc_ref[...]                                   # (C, TL)  current tile of x
    lane = jax.lax.broadcasted_iota(jnp.int32, (C, TL), 1)

    edge_l = jnp.broadcast_to(xc[:, :1], (C, TL))      # replicate pad values
    edge_r = jnp.broadcast_to(xc[:, TL - 1:], (C, TL))

    rc = _roll(xc, d, roll_forward)                    # x shifted right by d (lane >= d valid)
    rc2 = _roll(xc, -d, roll_forward)                  # x shifted left by d (lane < TL-d valid)

    if has_halo:
        l = pl.program_id(1)
        is_first = l == 0
        is_last = l == pl.num_programs(1) - 1
        rl = _roll(hl_ref[...], d, roll_forward)       # (C, HW) lanes [0,d) hold x[t-d]
        rr = _roll(hr_ref[...], -d, roll_forward)      # (C, HW) lanes [HW-d,HW) hold x[t+d]
        if HW < TL:
            left_src = jnp.concatenate([rl, rc[:, HW:]], axis=-1)       # lane-aligned concat
            right_src = jnp.concatenate([rc2[:, :TL - HW], rr], axis=-1)
        else:
            left_src, right_src = rl, rr
        left_fill = jnp.where(is_first, edge_l, left_src)
        right_fill = jnp.where(is_last, edge_r, right_src)
    else:
        # Single L-tile: global left/right edges are inside this tile -> replicate pad.
        left_fill, right_fill = edge_l, edge_r

    x_m = jnp.where(lane >= d, rc, left_fill)          # x[t - d] with replicate pad
    x_p = jnp.where(lane < TL - d, rc2, right_fill)    # x[t + d] with replicate pad

    # Stack the three tap inputs along channels: one MXU push, contraction depth 3C.
    x3 = jnp.concatenate([x_m, xc, x_p], axis=0)       # (3C, TL)

    b = b_ref[...].astype(jnp.float32)                 # (3C, 1) = [b1; bs; b2]
    b1, bs, b2 = b[:C], b[C:2 * C], b[2 * C:]
    wsq = wsq_ref[...]                                 # (2C, C) = [ws; w2]
    ws, w2 = wsq[:C], wsq[C:]

    # layers[0]: dilated k=3 conv (fused taps) + ELU
    y1 = jnp.dot(w1_ref[...], x3, preferred_element_type=jnp.float32) + b1
    h1 = _elu(y1)

    # skip: 1x1 conv on x
    skip = jnp.dot(ws, xc, preferred_element_type=jnp.float32) + bs

    # layers[2]: 1x1 conv + ELU
    y2 = jnp.dot(w2, h1.astype(wsq.dtype), preferred_element_type=jnp.float32) + b2
    h2 = _elu(y2)

    o_ref[...] = (h2 + skip).astype(o_ref.dtype)


def residual_unit(x, params, dilation: int, *,
                  operand_dtype=jnp.float32, max_tile: int = 1024,
                  vmem_budget_bytes: int = 12 * 1024 * 1024):
    """x: (N, C, L) float32. params: dict of effective (weight-normed) conv weights."""
    N, C, L = x.shape
    d = int(dilation)
    if L % 128 != 0:
        # TODO(synk): pad L up to a multiple of 128 in the wrapper for ragged lengths.
        raise ValueError("residual_unit: L must be a multiple of 128")
    if not 1 <= d <= 128:
        # TODO(synk): halo blocks are one 128-lane tile wide; widen for dilation > 128.
        raise ValueError("residual_unit: dilation must be in [1, 128]")

    HW = 128                                   # halo width (one lane tile)
    in_esz = jnp.dtype(operand_dtype).itemsize
    out_esz = jnp.dtype(x.dtype).itemsize

    def vmem_est(tl, with_halo):
        xb = C * tl * in_esz
        hb = (2 * C * HW * in_esz) if with_halo else 0
        ob = C * tl * out_esz
        wb = (3 * C * C + 2 * C * C) * in_esz + 3 * C * 4
        return 2 * (xb + hb + ob) + 2 * wb     # double-buffered streams + residents (x2, conservative)

    # Largest multiple-of-128 divisor of L that is <= max_tile and fits the VMEM budget.
    TL, cand = 128, 128
    while cand <= min(L, max_tile):
        if L % cand == 0 and vmem_est(cand, cand < L) <= vmem_budget_bytes:
            TL = cand
        cand += 128
    n_l = L // TL
    nb = TL // HW                              # 128-blocks per L-tile
    has_halo = n_l > 1

    # Pack weights/biases into resident slabs (fewer, bigger BlockSpecs).
    w1 = params["w1"]                                                  # (C, C, 3)
    w1p = jnp.concatenate([w1[:, :, 0], w1[:, :, 1], w1[:, :, 2]],
                          axis=1).astype(operand_dtype)                # (C, 3C)
    wsq = jnp.concatenate([params["ws"][:, :, 0], params["w2"][:, :, 0]],
                          axis=0).astype(operand_dtype)                # (2C, C)
    b_all = jnp.concatenate([params["b1"], params["bs"], params["b2"]]
                            ).reshape(3 * C, 1).astype(jnp.float32)    # (3C, 1)
    xo = x.astype(operand_dtype)

    kernel = functools.partial(
        _residual_unit_kernel, dilation=d, channels=C, tile=TL, halo=HW,
        roll_forward=_roll_is_forward(), has_halo=has_halo)

    x_spec = pl.BlockSpec((None, C, TL), lambda n, l: (n, 0, l))
    resident = lambda shape: pl.BlockSpec(shape, lambda n, l: (0, 0))

    in_specs = [x_spec]
    operands = [xo]
    if has_halo:
        hl_spec = pl.BlockSpec((None, C, HW),
                               lambda n, l: (n, 0, jnp.maximum(l * nb - 1, 0)))
        hr_spec = pl.BlockSpec((None, C, HW),
                               lambda n, l: (n, 0, jnp.minimum((l + 1) * nb, L // HW - 1)))
        in_specs += [hl_spec, hr_spec]
        operands += [xo, xo]
    in_specs += [resident((C, 3 * C)), resident((2 * C, C)), resident((3 * C, 1))]
    operands += [w1p, wsq, b_all]

    return pl.pallas_call(
        kernel,
        out_shape=jax.ShapeDtypeStruct((N, C, L), x.dtype),
        grid_spec=pltpu.PrefetchScalarGridSpec(
            num_scalar_prefetch=0,
            grid=(N, n_l),
            in_specs=in_specs,
            out_specs=pl.BlockSpec((None, C, TL), lambda n, l: (n, 0, l)),
        ),
        compiler_params=pltpu.CompilerParams(
            dimension_semantics=("parallel", "parallel"),
            vmem_limit_bytes=32 * 1024 * 1024),
    )(*operands)


def weight_norm(v, g):
    """Effective weight of nn.utils.weight_norm: W = g * v / ||v||, norm over (in, k)."""
    norm = jnp.sqrt(jnp.sum(v * v, axis=(1, 2), keepdims=True))
    return g.reshape(-1, 1, 1) * v / norm


def make_params(key, C):
    ks = jax.random.split(key, 9)
    v1 = jax.random.normal(ks[0], (C, C, 3), jnp.float32) * 0.3
    g1 = 1.0 + 0.1 * jax.random.normal(ks[1], (C,), jnp.float32)
    b1 = 0.05 * jax.random.normal(ks[2], (C,), jnp.float32)

    v2 = jax.random.normal(ks[3], (C, C, 1), jnp.float32) * 0.3
    g2 = 1.0 + 0.1 * jax.random.normal(ks[4], (C,), jnp.float32)
    b2 = 0.05 * jax.random.normal(ks[5], (C,), jnp.float32)

    vs = jax.random.normal(ks[6], (C, C, 1), jnp.float32) * 0.3
    gs = 1.0 + 0.1 * jax.random.normal(ks[7], (C,), jnp.float32)
    bs = 0.05 * jax.random.normal(ks[8], (C,), jnp.float32)

    return {
        "w1": weight_norm(v1, g1), "b1": b1,
        "w2": weight_norm(v2, g2), "b2": b2,
        "ws": weight_norm(vs, gs), "bs": bs,
    }


def reference(x, params, dilation):
    """Pure-JAX reference matching the PyTorch semantics (replicate pad, ELU alpha=1)."""
    N, C, L = x.shape
    d = dilation
    xp = jnp.pad(x, ((0, 0), (0, 0), (d, d)), mode="edge")
    w1, b1 = params["w1"], params["b1"]
    y1 = (jnp.einsum("oi,nil->nol", w1[:, :, 0], xp[:, :, 0:L])
          + jnp.einsum("oi,nil->nol", w1[:, :, 1], xp[:, :, d:d + L])
          + jnp.einsum("oi,nil->nol", w1[:, :, 2], xp[:, :, 2 * d:2 * d + L])
          + b1[None, :, None])
    h1 = jnp.where(y1 > 0, y1, jnp.expm1(jnp.minimum(y1, 0.0)))
    y2 = jnp.einsum("oi,nil->nol", params["w2"][:, :, 0], h1) + params["b2"][None, :, None]
    h2 = jnp.where(y2 > 0, y2, jnp.expm1(jnp.minimum(y2, 0.0)))
    skip = jnp.einsum("oi,nil->nol", params["ws"][:, :, 0], x) + params["bs"][None, :, None]
    return h2 + skip


if __name__ == "__main__":
    key = jax.random.PRNGKey(0)
    kx, kp, kx2 = jax.random.split(key, 3)

    # Multi-tile case: TL=1024, n_l=3 (first / middle / last tiles -> both halos exercised).
    N, C, L = 2, 16, 3072
    x = jax.random.normal(kx, (N, C, L), jnp.float32)
    params = make_params(kp, C)

    for dil in (1, 3, 9):
        out = jax.block_until_ready(residual_unit(x, params, dil))
        ref = reference(x, params, dil)
        assert out.shape == (N, C, L)
        assert jnp.allclose(out, ref, atol=1e-4, rtol=1e-4), f"f32 mismatch, dilation={dil}"

    # Single-tile case (no halo inputs / DMAs): L fits in one lane tile.
    x2 = jax.random.normal(kx2, (2, C, 256), jnp.float32)
    out2 = jax.block_until_ready(residual_unit(x2, params, 3))
    assert jnp.allclose(out2, reference(x2, params, 3), atol=1e-4, rtol=1e-4), \
        "single-tile path mismatch"

    # bf16 operand / f32 accumulation fast path (v6e/v7x): looser tolerance.
    out_bf = jax.block_until_ready(
        residual_unit(x, params, 3, operand_dtype=jnp.bfloat16))
    ref3 = reference(x, params, 3)
    assert jnp.allclose(out_bf, ref3, atol=0.1, rtol=0.1), "bf16 path out of tolerance"

    print("KERNEL_OK")
</pallas_src>

<mosaic_0001>
module attributes {stable_mosaic.version = 11 : i64} {
  func.func @probe(%arg0: memref<8x128xf32, #tpu.memory_space<vmem>>, %arg1: memref<8x128xf32, #tpu.memory_space<vmem>>) attributes {dimension_semantics = [], scalar_prefetch = 0 : i64, scratch_operands = 0 : i64, tpu.core_type = #tpu.core_type<tc>} {
    %c0 = arith.constant 0 : index
    %c0_0 = arith.constant 0 : index
    %0 = vector.load %arg0[%c0, %c0_0] : memref<8x128xf32, #tpu.memory_space<vmem>>, vector<8x128xf32>
    %c1_i32 = arith.constant 1 : i32
    %1 = tpu.dynamic_rotate %0 by %c1_i32 dim 1 : vector<8x128xf32>, i32 -> vector<8x128xf32>
    %c0_1 = arith.constant 0 : index
    %c0_2 = arith.constant 0 : index
    %2 = vector.load %arg1[%c0_1, %c0_2] : memref<8x128xf32, #tpu.memory_space<vmem>>, vector<8x128xf32>
    tpu.vector_store %arg1[%c0_1, %c0_2], %1 {strides = array<i32>} : memref<8x128xf32, #tpu.memory_space<vmem>>, vector<8x128xf32>,
    return
  }
}

</mosaic_0001>

<bundles_post_ra>
// kernel: tpu_custom_call.1
= control target key start
LH: loop header
LB: loop body
LE: loop exit
PB: predicated region body
PF: predicated region fallthrough
CT: control target
= control target key end

     0   :  { %6 = vsyncpa [#allocation3], 0  ;;  %s128_s0 = inlined_call_operand.hbm [shape: f32[8,128], index: 0, kind: input, shape index: {}]   ;;  %s129_s1 = inlined_call_operand.hbm [shape: f32[8,128], index: 1, kind: output, shape index: {}]  }
   0x1   :  { %7 = vsyncpa [#allocation4], 0  ;;  %s91_s6 = smov [#allocation2]   ;;  %s43_s10 = scalar_lea.hbm %s128_s0, 128 }
   0x2   :  { %s14_s7 = sshll.u32 %s91_s6, 4  ;;  %p44_p0 = scmp.ne.s32.totalorder %s128_s0, %s43_s10  ;;  %s15_s7 = int_to_ptr.vmem [resolvable:$true] %s14_s7 }
   0x3   :  { %p47_p1 = scmp.lt.u32.totalorder %s43_s10, %s128_s0 }
   0x5   :  { %p49_p2 = pnand %p47_p1, %p44_p0 }
   0x7   :  { %52 = shalt.err (!%p49_p2)
}
   0x8   :  { %s53_s15 = scalar_lea.vmem %s15_s7, 128  ;;  %p58_p4 = scmp.lt.s32.totalorder %s15_s7, %s15_s7 }
   0x9   :  { %p54_p3 = scmp.ne.s32.totalorder %s15_s7, %s53_s15  ;;  %p59_p5 = scmp.lt.s32.totalorder %s53_s15, %s53_s15 }
   0xb   :  { %p60_p6 = por %p59_p5, %p58_p4 }
   0xd   :  { %p61_p7 = pnand %p60_p6, %p54_p3 }
   0xf   :  { %64 = shalt.err (!%p61_p7)
}
  0x10   :  { %17 = dma.hbm_to_vmem [thread:$0]  %s128_s0, 128, %s15_s7, [#allocation3]  }
  0x11   :  { %87 = dma.done.wait [#allocation3], 128  }
  0x12   :  { %88 = vsyncadd [#allocation3], 4294967168  ;;  %v21_v0 = vld [vmem:[#allocation2] sm:$0xff]  ;;  %s92_s18 = smov 1   ;;  %s93_s19 = smov [#allocation5]  }
  0x13   :  { %22 = vrot.lane.b32.xlu0 %v21_v0, %s92_s18  ;;  %s31_s20 = sshll.u32 %s93_s19, 4  ;;  %s32_s20 = int_to_ptr.vmem [resolvable:$true] %s31_s20 }
  0x14   :  { %s65_s21 = scalar_lea.vmem %s32_s20, 128  ;;  %p70_p9 = scmp.lt.s32.totalorder %s32_s20, %s32_s20 }
  0x15   :  { %p66_p8 = scmp.ne.s32.totalorder %s32_s20, %s65_s21  ;;  %p71_p10 = scmp.lt.s32.totalorder %s65_s21, %s65_s21 }
  0x17   :  { %p72_p11 = por %p71_p10, %p70_p9 }
  0x19   :  { %p73_p12 = pnand %p72_p11, %p66_p8 }
  0x85   :  { %v23_v1 = vpop.permute.xlu0 %22 }
  0x86   :  { %24 = vst [vmem:[#allocation5] sm:$0xff] %v23_v1 }
  0x87   :  { %76 = shalt.err (!%p73_p12)
}
  0x88   :  { %s77_s0 = scalar_lea.hbm %s129_s1, 128 }
  0x89   :  { %p78_p13 = scmp.ne.s32.totalorder %s129_s1, %s77_s0  ;;  %p81_p0 = scmp.lt.u32.totalorder %s77_s0, %s129_s1 }
  0x8b   :  { %p83_p1 = pnand %p81_p0, %p78_p13 }
  0x8d   :  { %86 = shalt.err (!%p83_p1)
}
  0x8e   :  { %34 = dma.vmem_to_hbm [thread:$0]  %s32_s20, 128, %s129_s1, [#allocation4]  }
  0x8f   :  { %89 = dma.done.wait [#allocation4], 128  }
  0x90   :  { %90 = vsyncadd [#allocation4], 4294967168 }
  0x91   :  { %38 = vsyncpa [#allocation3], 1 }
  0x92   :  { %39 = vsyncpa [#allocation4], 1 }

</bundles_post_ra>
